<compile_context>
chip_gen: v7x
topology: tpu7x:2x2x1
jax: 0.10.0
libtpu: 0.0.40
codegen_flags: <defaults>
</compile_context>

<pallas_src>
import jax
import jax.numpy as jnp
import numpy as np
from jax.experimental import pallas as pl
from jax.experimental.pallas import tpu as pltpu

INPUT_SIZE = 9
HIDDEN_SIZE = 20


def gru_cell_kernel(x_ref, w_ref, b_ref, bhn_ref, o_ref):
    """Fused GRUCell gates (h = 0) in transposed / lane-major layout.

    x_ref:   (I, N)   input columns, N = batch*seq
    w_ref:   (3H, I)  packed [W_ir; W_iz; W_in]
    b_ref:   (3H, 1)  packed [b_ir+b_hr; b_iz+b_hz; b_in]
    bhn_ref: (H, 1)   b_hn (scaled by r)
    o_ref:   (H, N)   h'^T
    """
    H = HIDDEN_SIZE
    # Single MXU pass for all three gates: (3H, I) @ (I, N) -> (3H, N).
    gates = jnp.dot(w_ref[...], x_ref[...],
                    preferred_element_type=jnp.float32) + b_ref[...]
    # One sigmoid over the fused r|z slab.
    rz = jax.nn.sigmoid(gates[:2 * H, :])
    r = rz[:H, :]
    z = rz[H:, :]
    n = jnp.tanh(gates[2 * H:, :] + r * bhn_ref[...])
    # h' = (1 - z) * n + z * h, with h = 0.
    o_ref[...] = ((1.0 - z) * n).astype(o_ref.dtype)


def gru_cell_forward(input_seq, params):
    """input_seq: (L, B, I) float32 -> (B, L, H) float32 (== torch.stack(.., dim=1))."""
    L, B, I = input_seq.shape
    H = HIDDEN_SIZE
    # Lane-major input: columns ordered batch-major / seq-minor so the
    # kernel's (H, B*L) output maps straight onto (B, L, H) afterwards.
    x_t = jnp.transpose(input_seq, (2, 1, 0)).reshape(I, B * L)

    vmem = pl.BlockSpec(memory_space=pltpu.MemorySpace.VMEM)
    out_t = pl.pallas_call(
        gru_cell_kernel,
        out_shape=jax.ShapeDtypeStruct((H, B * L), jnp.float32),
        in_specs=[vmem, vmem, vmem, vmem],
        out_specs=vmem,
    )(x_t, params["w"], params["b"], params["b_hn"])

    # (H, B*L) -> (B, L, H)   (tiny plain-JAX glue outside the kernel)
    return out_t.T.reshape(B, L, H)


def init_params(key):
    """Deterministic init matching nn.GRUCell(9, 20) parameter shapes
    (uniform(-1/sqrt(H), 1/sqrt(H))), packed for the fused kernel."""
    H, I = HIDDEN_SIZE, INPUT_SIZE
    k = 1.0 / float(np.sqrt(H))
    k0, k1, k2, k3 = jax.random.split(key, 4)
    w_ih = jax.random.uniform(k0, (3 * H, I), jnp.float32, -k, k)   # [r; z; n]
    w_hh = jax.random.uniform(k1, (3 * H, H), jnp.float32, -k, k)   # unused: h == 0
    b_ih = jax.random.uniform(k2, (3 * H,), jnp.float32, -k, k)
    b_hh = jax.random.uniform(k3, (3 * H,), jnp.float32, -k, k)
    del w_hh  # W_hh @ 0 == 0, so it never affects this forward pass

    b_cat = jnp.concatenate([
        b_ih[0:H] + b_hh[0:H],            # r gate bias (ih + hh)
        b_ih[H:2 * H] + b_hh[H:2 * H],    # z gate bias (ih + hh)
        b_ih[2 * H:3 * H],                # n gate input bias
    ]).reshape(3 * H, 1)

    return {
        "w": jnp.asarray(w_ih),                      # (3H, I) — already W^T wrt x
        "b": b_cat,                                  # (3H, 1)
        "b_hn": b_hh[2 * H:3 * H].reshape(H, 1),     # (H, 1)
    }


def gru_cell_reference(input_seq, params):
    """Pure-JAX reference of the same math (row-major layout, for verification)."""
    L, B, I = input_seq.shape
    H = HIDDEN_SIZE
    x = input_seq.reshape(L * B, I)
    gates = x @ params["w"].T + params["b"].T        # (L*B, 3H)
    r = jax.nn.sigmoid(gates[:, :H])
    z = jax.nn.sigmoid(gates[:, H:2 * H])
    n = jnp.tanh(gates[:, 2 * H:] + r * params["b_hn"].T)
    h = (1.0 - z) * n
    return h.reshape(L, B, H).transpose(1, 0, 2)


if __name__ == "__main__":
    key = jax.random.PRNGKey(0)
    pkey, xkey = jax.random.split(key)
    params = init_params(pkey)

    # Matches the module: input_seq = torch.randn(24, 10, 9)  (seq=24, batch=10)
    input_seq = jax.random.normal(xkey, (24, 10, INPUT_SIZE), dtype=jnp.float32)

    out = gru_cell_forward(input_seq, params)
    out = jax.block_until_ready(out)

    assert out.shape == (10, 24, HIDDEN_SIZE), out.shape
    ref = gru_cell_reference(input_seq, params)
    np.testing.assert_allclose(np.asarray(out), np.asarray(ref),
                               rtol=1e-5, atol=1e-5)
    print("KERNEL_OK")
</pallas_src>

<mosaic_0001>
module attributes {stable_mosaic.version = 11 : i64} {
  func.func @gru_cell_kernel(%arg0: memref<9x240xf32, #tpu.memory_space<vmem>>, %arg1: memref<60x9xf32, #tpu.memory_space<vmem>>, %arg2: memref<60x1xf32, #tpu.memory_space<vmem>>, %arg3: memref<20x1xf32, #tpu.memory_space<vmem>>, %arg4: memref<20x240xf32, #tpu.memory_space<vmem>>) attributes {dimension_semantics = [], scalar_prefetch = 0 : i64, scratch_operands = 0 : i64, tpu.core_type = #tpu.core_type<tc>} {
    %c0 = arith.constant 0 : index
    %c0_0 = arith.constant 0 : index
    %0 = vector.load %arg1[%c0, %c0_0] : memref<60x9xf32, #tpu.memory_space<vmem>>, vector<60x9xf32>
    %c0_1 = arith.constant 0 : index
    %c0_2 = arith.constant 0 : index
    %1 = vector.load %arg0[%c0_1, %c0_2] : memref<9x240xf32, #tpu.memory_space<vmem>>, vector<9x240xf32>
    %cst = arith.constant dense<0.000000e+00> : vector<60x240xf32>
    %2 = tpu.matmul %0, %1, %cst {dimension_numbers = #tpu.dot_dimension_numbers<[1], [0], [0], [1], [0, 0, 1, 1], [], []>} : vector<60x9xf32>, vector<9x240xf32>, vector<60x240xf32> -> vector<60x240xf32>
    %c0_3 = arith.constant 0 : index
    %c0_4 = arith.constant 0 : index
    %3 = vector.load %arg2[%c0_3, %c0_4] : memref<60x1xf32, #tpu.memory_space<vmem>>, vector<60x1xf32>
    %4 = vector.broadcast %3 : vector<60x1xf32> to vector<60x240xf32>
    %5 = arith.addf %2, %4 : vector<60x240xf32>
    %6 = vector.extract_strided_slice %5 {offsets = [0, 0], sizes = [40, 240], strides = [1, 1]} : vector<60x240xf32> to vector<40x240xf32>
    %7 = arith.negf %6 : vector<40x240xf32>
    %8 = math.exp %7 : vector<40x240xf32>
    %cst_5 = arith.constant 1.000000e+00 : f32
    %9 = vector.broadcast %cst_5 : f32 to vector<40x240xf32>
    %10 = arith.addf %9, %8 : vector<40x240xf32>
    %11 = arith.divf %9, %10 : vector<40x240xf32>
    %12 = vector.extract_strided_slice %11 {offsets = [0, 0], sizes = [20, 240], strides = [1, 1]} : vector<40x240xf32> to vector<20x240xf32>
    %13 = vector.extract_strided_slice %11 {offsets = [20, 0], sizes = [20, 240], strides = [1, 1]} : vector<40x240xf32> to vector<20x240xf32>
    %14 = vector.extract_strided_slice %5 {offsets = [40, 0], sizes = [20, 240], strides = [1, 1]} : vector<60x240xf32> to vector<20x240xf32>
    %c0_6 = arith.constant 0 : index
    %c0_7 = arith.constant 0 : index
    %15 = vector.load %arg3[%c0_6, %c0_7] : memref<20x1xf32, #tpu.memory_space<vmem>>, vector<20x1xf32>
    %16 = vector.broadcast %15 : vector<20x1xf32> to vector<20x240xf32>
    %17 = arith.mulf %12, %16 : vector<20x240xf32>
    %18 = arith.addf %14, %17 : vector<20x240xf32>
    %19 = math.tanh %18 : vector<20x240xf32>
    %cst_8 = arith.constant 1.000000e+00 : f32
    %20 = vector.broadcast %cst_8 : f32 to vector<20x240xf32>
    %21 = arith.subf %20, %13 : vector<20x240xf32>
    %22 = arith.mulf %21, %19 : vector<20x240xf32>
    %c0_9 = arith.constant 0 : index
    %c0_10 = arith.constant 0 : index
    %23 = vector.load %arg4[%c0_9, %c0_10] : memref<20x240xf32, #tpu.memory_space<vmem>>, vector<20x240xf32>
    tpu.vector_store %arg4[%c0_9, %c0_10], %22 {strides = array<i32>} : memref<20x240xf32, #tpu.memory_space<vmem>>, vector<20x240xf32>,
    return
  }
}

</mosaic_0001>

<bundles_post_ra>
// kernel: tpu_custom_call.1
= control target key start
LH: loop header
LB: loop body
LE: loop exit
PB: predicated region body
PF: predicated region fallthrough
CT: control target
= control target key end

     0   :  { %vm103_vm0 = vcmask 1040384   ;;  %vm512_vm1 = vmmov 1   ;;  %v513_v6 = vmov 0.0   ;;  %vm78_vm3 = vcmask 72704   ;;  %s660_s0 = inlined_call_operand.vmem [shape: f32[9,240], index: 0, kind: input, shape index: {}]   ;;  %s661_s1 = inlined_call_operand.vmem [shape: f32[60,9], index: 1, kind: input, shape index: {}]   ;;  %s662_s2 = inlined_call_operand.vmem [shape: f32[60,1], index: 2, kind: input, shape index: {}]   ;;  %s663_s3 = inlined_call_operand.vmem [shape: f32[20,1], index: 3, kind: input, shape index: {}]   ;;  %s664_s4 = inlined_call_operand.hbm [shape: f32[20,240], index: 4, kind: output, shape index: {}]  }
   0x1   :  { %v27_v0 = vld [vmem:[%s660_s0 + $0x8] sm:$0xff]  ;;  %v29_v1 = vld [vmem:[%s660_s0 + $0x18] sm:$0x1]  ;;  %v26_v2 = vld [vmem:[%s660_s0] sm:$0xff]  ;;  %174 = vmatprep.mubr.f32.mxu0 %v513_v6  ;;  %198 = vmatprep.mubr.f32.mxu1 %v513_v6  ;;  %v514_v10 = vmov 0  }
   0x2   :  { %v420_v3 = vpack.c.bf16 %v29_v1, %v27_v0  ;;  %vm421_vm2 = vmpackc.low %vm103_vm0, %vm512_vm1  ;;  %v28_v4 = vld [vmem:[%s660_s0 + $0x10] sm:$0x1]  ;;  %v18_v7 = vld [vmem:[%s661_s1] sm:$0xff]  ;;  %434 = vset.pattern.permute.xlu0 %v514_v10  ;;  %435 = vset.pattern.permute.xlu1 %v514_v10 }
   0x3   :  { %v423_v5 = vpack.c.bf16 %v28_v4, %v26_v2  ;;  %v22_v8 = vld [vmem:[%s661_s1 + $0x20] sm:$0xff]  ;;  %v32_v11 = vld [vmem:[%s662_s2 + $0x10] sm:$0xff]  ;;  %v31_v12 = vld [vmem:[%s662_s2 + $0x8] sm:$0xff] }
   0x4   :  { %422 = vmatprep.subr.msk.bf16.mxu0 %vm421_vm2, %v420_v3  ;;  %426 = vmatprep.subr.msk.bf16.mxu1 %vm421_vm2, %v420_v3  ;;  %v30_v9 = vld [vmem:[%s662_s2] sm:$0xff]  ;;  %v33_v13 = vld [vmem:[%s662_s2 + $0x18] sm:$0xff]  ;;  %v19_v14 = vld [vmem:[%s661_s1 + $0x8] sm:$0xff] }
   0x5   :  { %425 = vmatpush1.bf16.msk.msra.mxu0 %vm421_vm2, %v423_v5  ;;  %427 = vmatpush1.bf16.msk.msra.mxu1 %vm421_vm2, %v423_v5  ;;  %v23_v15 = vld [vmem:[%s661_s1 + $0x28] sm:$0xff] }
   0x6   :  { %40 = vperm.xlu0 %434, %v30_v9   ;;  %50 = vperm.xlu1 %435, %v32_v11  }
   0x8   :  { %402 = vmatmul.mubr.msk.f32.vlgmr.msra.gmra.mrb[0].mxu0 %vm78_vm3, %v18_v7  ;;  %406 = vmatmul.mubr.msk.f32.vlgmr.msra.gmra.mrb[0].mxu1 %vm78_vm3, %v22_v8 }
   0x9   :  { %180 = vmatprep.mubr.f32.mxu0 %v513_v6  ;;  %204 = vmatprep.mubr.f32.mxu1 %v513_v6 }
   0xa   :  { %9 = vsyncpa [#allocation3], 0  ;;  %45 = vperm.xlu0 %434, %v31_v12   ;;  %55 = vperm.xlu1 %435, %v33_v13   ;;  %v34_v16 = vld [vmem:[%s662_s2 + $0x20] sm:$0xff]  ;;  %v35_v17 = vld [vmem:[%s662_s2 + $0x28] sm:$0xff]  ;;  %vm331_vm4 = vcmask 1043456   ;;  %vm377_vm5 = vcmask 916480  }
   0xb   :  { %v20_v18 = vld [vmem:[%s661_s1 + $0x10] sm:$0xff]  ;;  %v37_v21 = vld [vmem:[%s662_s2 + $0x38] sm:$0xf]  ;;  %v283_v24 = vld [vmem:[%s663_s3] sm:$0xff]  ;;  %vm382_vm6 = vcmask 912384  }
   0xc   :  { %403 = vmatmul.mubr.msk.f32.gmra.mrb[2].mxu0 %vm78_vm3, %v19_v14  ;;  %407 = vmatmul.mubr.msk.f32.gmra.mrb[2].mxu1 %vm78_vm3, %v23_v15  ;;  %v24_v19 = vld [vmem:[%s661_s1 + $0x30] sm:$0xff]  ;;  %v21_v22 = vld [vmem:[%s661_s1 + $0x18] sm:$0xff]  ;;  %v284_v25 = vld [vmem:[%s663_s3 + $0x8] sm:$0xff] }
   0xd   :  { %186 = vmatprep.mubr.f32.mxu0 %v513_v6  ;;  %210 = vmatprep.mubr.f32.mxu1 %v513_v6  ;;  %v36_v20 = vld [vmem:[%s662_s2 + $0x30] sm:$0xff]  ;;  %v25_v23 = vld [vmem:[%s661_s1 + $0x38] sm:$0xf]  ;;  %s515_s1 = smov [#allocation2]  }
   0xe   :  { %60 = vperm.xlu0 %434, %v34_v16   ;;  %65 = vperm.xlu1 %435, %v35_v17   ;;  %v285_v26 = vld [vmem:[%s663_s3 + $0x10] sm:$0xf]  ;;  %s389_s3 = sshll.u32 %s515_s1, 4  ;;  %s390_s3 = int_to_ptr.vmem [resolvable:$true] %s389_s3 }
   0xf   :  { %s488_s6 = scalar_lea.vmem %s390_s3, 768  ;;  %p493_p1 = scmp.lt.s32.totalorder %s390_s3, %s390_s3 }
  0x10   :  { %404 = vmatmul.mubr.msk.f32.gmra.mrb[4].mxu0 %vm78_vm3, %v20_v18  ;;  %408 = vmatmul.mubr.msk.f32.gmra.mrb[4].mxu1 %vm78_vm3, %v24_v19  ;;  %p489_p0 = scmp.ne.s32.totalorder %s390_s3, %s488_s6  ;;  %p494_p2 = scmp.lt.s32.totalorder %s488_s6, %s488_s6 }
  0x11   :  { %192 = vmatprep.mubr.f32.mxu0 %v513_v6  ;;  %216 = vmatprep.mubr.f32.mxu1 %v513_v6 }
  0x12   :  { %70 = vperm.xlu0 %434, %v36_v20   ;;  %75 = vperm.xlu1 %435, %v37_v21   ;;  %p495_p3 = por %p494_p2, %p493_p1 }
  0x14   :  { %405 = vmatmul.mubr.msk.f32.gmra.mrb[6].mxu0 %vm78_vm3, %v21_v22  ;;  %409 = vmatmul.mubr.msk.f32.gmra.mrb[6].mxu1 %vm78_vm3, %v25_v23  ;;  %p496_p4 = pnand %p495_p3, %p489_p0 }
  0x16   :  { %288 = vperm.xlu0 %434, %v283_v24   ;;  %293 = vperm.xlu1 %435, %v284_v25  }
  0x1a   :  { %298 = vperm.xlu0 %434, %v285_v26  }
  0x85   :  { %v41_v27 = vpop.permute.xlu0 %40  ;;  %v51_v35 = vpop.permute.xlu1 %50 }
  0x89   :  { %v46_v28 = vpop.permute.xlu0 %45  ;;  %v56_v54 = vpop.permute.xlu1 %55 }
  0x8d   :  { %v61_v44 = vpop.permute.xlu0 %60  ;;  %v66_v9 = vpop.permute.xlu1 %65 }
  0x91   :  { %v71_v13 = vpop.permute.xlu0 %70  ;;  %v76_v19 = vpop.permute.xlu1 %75 }
  0x95   :  { %v289_v22 = vpop.permute.xlu0 %288 }
  0xdb   :  { %v176_v29 = vpop.f32.mrb[0].mxu0  ;;  %v200_v30 = vpop.f32.mrb[0].mxu1 }
  0xdc   :  { %v177_v31 = vadd.f32 %v176_v29, %v41_v27  ;;  %v178_v32 = vpop.f32.mrb[1].mxu0  ;;  %v202_v33 = vpop.f32.mrb[1].mxu1  ;;  %v201_v46 = vadd.f32 %v200_v30, %v61_v44 }
  0xdd   :  { %v179_v34 = vadd.f32 %v178_v32, %v41_v27  ;;  %v203_v60 = vadd.f32 %v202_v33, %v61_v44  ;;  %v294_v33 = vpop.permute.xlu1 %293  ;;  %v299_v44 = vpop.permute.xlu0 %298 }
  0xde   :  { %v410_v36 = vmul.f32 -1.442695, %v177_v31  ;;  %v418_v56 = vmul.f32 -1.442695, %v201_v46 }
  0xdf   :  { %v411_v37 = vmul.f32 -1.442695, %v179_v34  ;;  %v182_v38 = vpop.f32.mrb[2].mxu0  ;;  %v620_v39 = vpop.f32.mrb[2].mxu1  ;;  %v419_v6 = vmul.f32 -1.442695, %v203_v60 }
  0xe0   :  { %436 = vpow2.f32 %v410_v36  ;;  %v183_v40 = vadd.f32 %v182_v38, %v46_v28  ;;  %v184_v41 = vpop.f32.mrb[3].mxu0  ;;  %v622_v42 = vpop.f32.mrb[3].mxu1  ;;  %v207_v25 = vadd.f32 %v620_v39, %v66_v9 }
  0xe1   :  { %438 = vpow2.f32 %v411_v37  ;;  %v185_v43 = vadd.f32 %v184_v41, %v46_v28  ;;  %v209_v26 = vadd.f32 %v622_v42, %v66_v9 }
  0xe2   :  { %v412_v45 = vmul.f32 -1.442695, %v183_v40 }
  0xe3   :  { %v413_v47 = vmul.f32 -1.442695, %v185_v43  ;;  %v188_v48 = vpop.f32.mrb[4].mxu0  ;;  %v624_v49 = vpop.f32.mrb[4].mxu1 }
  0xe4   :  { %440 = vpow2.f32 %v412_v45  ;;  %v189_v50 = vadd.f32 %v188_v48, %v51_v35  ;;  %v190_v51 = vpop.f32.mrb[5].mxu0  ;;  %v626_v52 = vpop.f32.mrb[5].mxu1  ;;  %v213_v36 = vadd.f32 %v624_v49, %v71_v13 }
  0xe5   :  { %442 = vpow2.f32 %v413_v47  ;;  %v191_v53 = vadd.f32 %v190_v51, %v51_v35  ;;  %v215_v39 = vadd.f32 %v626_v52, %v71_v13 }
  0xe6   :  { %v414_v55 = vmul.f32 -1.442695, %v189_v50 }
  0xe7   :  { %v415_v57 = vmul.f32 -1.442695, %v191_v53  ;;  %v194_v58 = vpop.f32.mrb[6].mxu0  ;;  %v628_v59 = vpop.f32.mrb[6].mxu1 }
  0xe8   :  { %444 = vpow2.f32 %v414_v55  ;;  %v195_v61 = vadd.f32 %v194_v58, %v56_v54  ;;  %v196_v62 = vpop.f32.mrb[7].mxu0  ;;  %v630_v63 = vpop.f32.mrb[7].mxu1  ;;  %v219_v48 = vadd.f32 %v628_v59, %v76_v19 }
  0xe9   :  { %446 = vpow2.f32 %v415_v57  ;;  %v197_v4 = vadd.f32 %v196_v62, %v56_v54  ;;  %v221_v49 = vadd.f32 %v630_v63, %v76_v19 }
  0xea   :  { %v437_v0 = vpop.eup %436  ;;  %v416_v1 = vmul.f32 -1.442695, %v195_v61  ;;  %448 = vpow2.f32 %v418_v56 }
  0xeb   :  { %v439_v2 = vpop.eup %438  ;;  %v253_v3 = vadd.f32 1.0, %v437_v0  ;;  %v417_v11 = vmul.f32 -1.442695, %v197_v4 }
  0xec   :  { %v254_v5 = vadd.f32 1.0, %v439_v2  ;;  %450 = vpow2.f32 %v416_v1 }
  0xed   :  { %452 = vrcp.f32 %v253_v3 }
  0xee   :  { %v441_v7 = vpop.eup %440  ;;  %454 = vrcp.f32 %v254_v5 }
  0xef   :  { %v443_v8 = vpop.eup %442  ;;  %v255_v10 = vadd.f32 1.0, %v441_v7  ;;  %456 = vpow2.f32 %v419_v6 }
  0xf0   :  { %v256_v12 = vadd.f32 1.0, %v443_v8 }
  0xf1   :  { %458 = vrcp.f32 %v255_v10 }
  0xf2   :  { %v445_v14 = vpop.eup %444  ;;  %460 = vrcp.f32 %v256_v12 }
  0xf3   :  { %v447_v15 = vpop.eup %446  ;;  %v257_v16 = vadd.f32 1.0, %v445_v14  ;;  %462 = vpow2.f32 %v417_v11 }
  0xf4   :  { %v258_v17 = vadd.f32 1.0, %v447_v15  ;;  %v449_v18 = vpop.eup %448 }
  0xf5   :  { %464 = vrcp.f32 %v257_v16  ;;  %v261_v29 = vadd.f32 1.0, %v449_v18 }
  0xf6   :  { %v451_v20 = vpop.eup %450  ;;  %466 = vrcp.f32 %v258_v17 }
  0xf7   :  { %v453_v21 = vpop.eup %452  ;;  %v259_v34 = vadd.f32 1.0, %v451_v20 }
  0xf8   :  { %v455_v23 = vpop.eup %454  ;;  %v301_v24 = vmul.f32 %v453_v21, %v289_v22 }
  0xf9   :  { %v302_v27 = vmul.f32 %v455_v23, %v289_v22  ;;  %v457_v28 = vpop.eup %456 }
  0xfa   :  { %v307_v30 = vadd.f32 %v301_v24, %v207_v25  ;;  %v262_v45 = vadd.f32 1.0, %v457_v28 }
  0xfb   :  { %v459_v31 = vpop.eup %458  ;;  %v308_v32 = vadd.f32 %v302_v27, %v209_v26 }
  0xfc   :  { %v461_v35 = vpop.eup %460  ;;  %468 = vtanh.f32 %v307_v30  ;;  %v303_v37 = vmul.f32 %v459_v31, %v294_v33 }
  0xfd   :  { %v463_v38 = vpop.eup %462  ;;  %470 = vtanh.f32 %v308_v32  ;;  %v304_v40 = vmul.f32 %v461_v35, %v294_v33 }
  0xfe   :  { %472 = vrcp.f32 %v261_v29  ;;  %v309_v41 = vadd.f32 %v303_v37, %v213_v36  ;;  %v260_v42 = vadd.f32 1.0, %v463_v38 }
  0xff   :  { %v465_v43 = vpop.eup %464  ;;  %v310_v46 = vadd.f32 %v304_v40, %v215_v39  ;;  %474 = vrcp.f32 %v259_v34 }
 0x100   :  { %v467_v47 = vpop.eup %466  ;;  %476 = vtanh.f32 %v309_v41  ;;  %v305_v50 = vmul.f32 %v465_v43, %v299_v44  ;;  %v319_v57 = vsub.f32 1.0, %v465_v43 }
 0x101   :  { %478 = vtanh.f32 %v310_v46  ;;  %v306_v51 = vmul.f32 %v467_v47, %v299_v44  ;;  %v320_v61 = vsub.f32 1.0, %v467_v47 }
 0x102   :  { %v311_v53 = vadd.f32 %v305_v50, %v219_v48  ;;  %480 = vrcp.f32 %v260_v42 }
 0x103   :  { %482 = vrcp.f32 %v262_v45  ;;  %v312_v52 = vadd.f32 %v306_v51, %v221_v49 }
 0x104   :  { %484 = vtanh.f32 %v311_v53 }
 0x105   :  { %486 = vtanh.f32 %v312_v52 }
 0x106   :  { %v469_v54 = vpop.eup %468 }
 0x107   :  { %v471_v55 = vpop.eup %470  ;;  %v332_v56 = vrot.slane %v469_v54, 4 }
 0x108   :  { %v473_v58 = vpop.eup %472  ;;  %v333_v60 = vrot.slane %v471_v55, 4 }
 0x109   :  { %v475_v62 = vpop.eup %474  ;;  %v348_v59 = vmul.f32 %v332_v56, %v319_v57  ;;  %v323_v15 = vsub.f32 1.0, %v473_v58 }
 0x10a   :  { %v477_v0 = vpop.eup %476  ;;  %v349_v1 = vmul.f32 %v333_v60, %v320_v61  ;;  %v321_v5 = vsub.f32 1.0, %v475_v62 }
 0x10b   :  { %v479_v63 = vpop.eup %478  ;;  %v334_v2 = vrot.slane %v477_v0, 4  ;;  %v360_v16 = vrot.slane %v348_v59, 4 }
 0x10c   :  { %v481_v3 = vpop.eup %480  ;;  %v336_v4 = vrot.slane %v479_v63, 4  ;;  %v363_v20 = vrot.slane %v349_v1, 4 }
 0x10d   :  { %v483_v6 = vpop.eup %482  ;;  %v335_v7 = vsel %vm331_vm4, %v332_v56, %v334_v2  ;;  %v322_v8 = vsub.f32 1.0, %v481_v3 }
 0x10e   :  { %v485_v9 = vpop.eup %484  ;;  %v337_v10 = vsel %vm331_vm4, %v333_v60, %v336_v4  ;;  %v350_v11 = vmul.f32 %v335_v7, %v321_v5  ;;  %v324_v19 = vsub.f32 1.0, %v483_v6 }
 0x10f   :  { %v487_v12 = vpop.eup %486  ;;  %v338_v13 = vrot.slane %v485_v9, 4  ;;  %v351_v14 = vmul.f32 %v337_v10, %v322_v8 }
 0x110   :  { %v361_v17 = vrot.slane %v350_v11, 4  ;;  %v340_v18 = vrot.slane %v487_v12, 4 }
 0x111   :  { %v339_v21 = vsel %vm331_vm4, %v334_v2, %v338_v13  ;;  %v364_v22 = vrot.slane %v351_v14, 4 }
 0x112   :  { %v362_v23 = vsel %vm331_vm4, %v360_v16, %v361_v17  ;;  %v352_v24 = vmul.f32 %v339_v21, %v323_v15  ;;  %v341_v25 = vsel %vm331_vm4, %v336_v4, %v340_v18 }
 0x113   :  { %376 = vst [vmem:[#allocation2] sm:$0xff] %v362_v23  ;;  %v365_v26 = vsel %vm331_vm4, %v363_v20, %v364_v22  ;;  %v353_v27 = vmul.f32 %v341_v25, %v324_v19 }
 0x114   :  { %v366_v28 = vrot.slane %v352_v24, 4  ;;  %378 = vst.msk [vmem:[#allocation2 + $0x8] sm:$0xff] %vm377_vm5, %v365_v26 }
 0x115   :  { %v368_v29 = vrot.slane %v353_v27, 4 }
 0x116   :  { %v367_v30 = vsel %vm331_vm4, %v361_v17, %v366_v28  ;;  %381 = vst [vmem:[#allocation2 + $0x20] sm:$0xf] %v366_v28 }
 0x117   :  { %379 = vst [vmem:[#allocation2 + $0x10] sm:$0xff] %v367_v30  ;;  %v369_v31 = vsel %vm331_vm4, %v364_v22, %v368_v29  ;;  %383 = vst.msk [vmem:[#allocation2 + $0x28] sm:$0xf] %vm382_vm6, %v368_v29 }
 0x118   :  { %380 = vst.msk [vmem:[#allocation2 + $0x18] sm:$0xff] %vm377_vm5, %v369_v31 }
 0x119   :  { %499 = shalt.err (!%p496_p4)
}
 0x11a   :  { %s500_s9 = scalar_lea.hbm %s664_s4, 768 }
 0x11b   :  { %p501_p5 = scmp.ne.s32.totalorder %s664_s4, %s500_s9  ;;  %p504_p6 = scmp.lt.u32.totalorder %s500_s9, %s664_s4 }
 0x11d   :  { %p506_p7 = pnand %p504_p6, %p501_p5 }
 0x11f   :  { %509 = shalt.err (!%p506_p7)
}
 0x120   :  { %s516_s14 = smov 256   ;;  %s517_s15 = smov 16  }
 0x121   :  { %395 = dma.vmem_to_hbm [thread:$0]  %s390_s3, 768, %s664_s4, [#allocation3], %s516_s14, %s516_s14, %s517_s15  }
 0x122   :  { %510 = dma.done.wait [#allocation3], 768  }
 0x123   :  { %511 = vsyncadd [#allocation3], 4294966528 }
 0x124   :  { %399 = vsyncpa [#allocation3], 1 }

</bundles_post_ra>
